<compile_context>
chip_gen: v7x
topology: tpu7x:2x2x1
jax: 0.10.0
libtpu: 0.0.40
codegen_flags: <defaults>
</compile_context>

<pallas_src>
import jax
import jax.numpy as jnp
from jax.experimental import pallas as pl
from jax.experimental.pallas import tpu as pltpu

# --------------------------- module configuration ---------------------------
# values_dict analog, kept small but TPU-friendly.
N = 2             # batch
C_IN = 1          # channels_in (module default)
L_IN = 136        # l_in  -> conv output length 128 (= one f32 vreg lane extent)
C_OUT = 8         # values_dict['channels_out'] (= one f32 vreg sublane extent)
K = 9             # values_dict['kernel']
STRIDE = 1        # values_dict['stride']
MP_K = 4          # values_dict['maxpool']['kernel']
MP_S = 4          # values_dict['maxpool']['stride']
ACT_FN = "gelu"   # values_dict['act_fn']
NORM = True       # values_dict['batch_normalization']
DROPOUT_P = 0.25  # values_dict['dropout'] (identity in eval mode)
EPS = 1e-5        # BatchNorm1d eps

L_CONV = (L_IN - K) // STRIDE + 1        # 128
L_POOL = (L_CONV - MP_K) // MP_S + 1     # 32

# roll+compaction pooling assumes non-overlapping, fully covering windows.
# TODO(synk): other maxpool configs (MP_K != MP_S) and STRIDE > 1 need a
#             different window-gather scheme and re-validation vs. reference.
assert MP_K == MP_S and L_CONV % MP_S == 0

_INV_SQRT2 = 0.7071067811865476


# ------------------------------- fused kernel --------------------------------
def cnn1d_fused_kernel(x_ref, w_ref, b_ref, scale_ref, shift_ref, sel_ref, o_ref):
    """Conv1d (shift-FMA) + bias + activation + eval-BN affine + MaxPool1d for
    ALL batch elements in one kernel step; everything stays in VMEM / vregs.

    x_ref:     (N, C_IN, L_IN)
    w_ref:     (C_OUT, C_IN*K)     PyTorch conv weight.reshape(C_OUT, C_IN*K)
    b_ref:     (C_OUT, 1)          conv bias
    scale_ref: (C_OUT, 1)          gamma / sqrt(running_var + eps)  (1 if !NORM)
    shift_ref: (C_OUT, 1)          beta - running_mean * scale      (0 if !NORM)
    sel_ref:   (L_CONV, L_POOL)    constant 0/1 matrix, column j picks lane j*MP_S
    o_ref:     (N, C_OUT, L_POOL)
    """
    w = w_ref[...]          # (C_OUT, C_IN*K)
    b = b_ref[...]          # (C_OUT, 1)
    scale = scale_ref[...]  # (C_OUT, 1)
    shift = shift_ref[...]  # (C_OUT, 1)
    sel = sel_ref[...]      # (L_CONV, L_POOL)

    # Static unroll over the (tiny) batch; for larger N, block B_TILE batch
    # elements per grid step instead (review #1 / #7).
    for n in range(N):
        xn = x_ref[n]                                   # (C_IN, L_IN)

        # ---- Conv1d as C_IN*K broadcast-FMA steps (VPU); no im2col, no MXU:
        #      acc[c, l] = sum_{ci,k} w[c, ci*K + k] * x[n, ci, l*STRIDE + k]
        acc = None
        for ci in range(C_IN):
            for k in range(K):
                idx = ci * K + k
                end = k + (L_CONV - 1) * STRIDE + 1
                term = w[:, idx:idx + 1] * xn[ci:ci + 1, k:end:STRIDE]
                acc = term if acc is None else acc + term   # (C_OUT, L_CONV)
        acc = acc + b                                        # (C_OUT, L_CONV)

        # ---- activation (exact GELU matches nn.GELU default)
        if ACT_FN == "relu":
            act = jnp.maximum(acc, 0.0)
        else:
            act = 0.5 * acc * (1.0 + jax.lax.erf(acc * _INV_SQRT2))

        # ---- eval-mode BatchNorm1d folded to a per-channel affine
        y = act * scale + shift                              # (C_OUT, L_CONV)

        # ---- MaxPool1d(MP_K, MP_S): lane rolls (XLU) + maxima (VPU) put each
        #      window max at its window-start lane, then one small MXU matmul
        #      with a constant 0/1 matrix compacts lanes {0, MP_S, ...} into a
        #      dense (C_OUT, L_POOL) tile (gather-free stride-MP_S compaction).
        t = y
        for r in range(1, MP_K):
            t = jnp.maximum(t, pltpu.roll(y, shift=L_CONV - r, axis=1))
        pooled = jnp.dot(t, sel, preferred_element_type=jnp.float32)

        # ---- dropout: identity in eval mode
        o_ref[n, :, :] = pooled


# ------------------------------ wrapper (glue) --------------------------------
@jax.jit
def cnn1d_forward(x_ncl, conv_w, conv_b, bn_gamma, bn_beta, bn_mean, bn_var):
    # Parameter folding only -- no im2col, no transposes, no intermediate HBM
    # tensors.  Input / output stay in PyTorch's (N, C, L) layout.
    w_mat = conv_w.reshape(C_OUT, C_IN * K).astype(jnp.float32)
    b_col = conv_b.reshape(C_OUT, 1).astype(jnp.float32)
    if NORM:
        scale = (bn_gamma * jax.lax.rsqrt(bn_var + EPS)).reshape(C_OUT, 1)
        shift = bn_beta.reshape(C_OUT, 1) - bn_mean.reshape(C_OUT, 1) * scale
    else:
        scale = jnp.ones((C_OUT, 1), jnp.float32)
        shift = jnp.zeros((C_OUT, 1), jnp.float32)

    # Constant 0/1 lane-compaction matrix (column j selects lane j*MP_S);
    # depends only on static shapes, so XLA constant-folds it (16 KiB).
    sel = (jnp.arange(L_CONV)[:, None] == MP_S * jnp.arange(L_POOL)[None, :]
           ).astype(jnp.float32)

    # Single fused step: whole arrays as blocks in VMEM (<100 KiB footprint).
    return pl.pallas_call(
        cnn1d_fused_kernel,
        grid=(1,),
        in_specs=[
            pl.BlockSpec((N, C_IN, L_IN), lambda i: (0, 0, 0)),
            pl.BlockSpec((C_OUT, C_IN * K), lambda i: (0, 0)),
            pl.BlockSpec((C_OUT, 1), lambda i: (0, 0)),
            pl.BlockSpec((C_OUT, 1), lambda i: (0, 0)),
            pl.BlockSpec((C_OUT, 1), lambda i: (0, 0)),
            pl.BlockSpec((L_CONV, L_POOL), lambda i: (0, 0)),
        ],
        out_specs=pl.BlockSpec((N, C_OUT, L_POOL), lambda i: (0, 0, 0)),
        out_shape=jax.ShapeDtypeStruct((N, C_OUT, L_POOL), jnp.float32),
        # No compiler_params: nothing to core-shard with one step (review #6)
        # and no VMEM limits needed at this footprint (review #7).
    )(x_ncl.astype(jnp.float32), w_mat, b_col,
      scale.astype(jnp.float32), shift.astype(jnp.float32), sel)


# --------------------------- pure-JAX reference -------------------------------
def cnn1d_reference(x, conv_w, conv_b, bn_gamma, bn_beta, bn_mean, bn_var):
    y = jax.lax.conv_general_dilated(
        x, conv_w, window_strides=(STRIDE,), padding="VALID",
        dimension_numbers=("NCH", "OIH", "NCH"),
        precision=jax.lax.Precision.HIGHEST)
    y = y + conv_b.reshape(1, C_OUT, 1)
    if ACT_FN == "relu":
        y = jnp.maximum(y, 0.0)
    else:
        y = jax.nn.gelu(y, approximate=False)
    if NORM:
        inv = jax.lax.rsqrt(bn_var + EPS).reshape(1, C_OUT, 1)
        y = ((y - bn_mean.reshape(1, C_OUT, 1)) * inv
             * bn_gamma.reshape(1, C_OUT, 1) + bn_beta.reshape(1, C_OUT, 1))
    y = jax.lax.reduce_window(y, -jnp.inf, jax.lax.max,
                              (1, 1, MP_K), (1, 1, MP_S), "VALID")
    return y  # dropout = identity in eval mode


# ----------------------------------- main -------------------------------------
if __name__ == "__main__":
    key = jax.random.PRNGKey(0)
    kx, kw, kb, kg, kbe, km, kv = jax.random.split(key, 7)

    # deterministic example input in PyTorch (N, C_in, L) layout
    x = jax.random.normal(kx, (N, C_IN, L_IN), dtype=jnp.float32)

    # deterministic parameters (shapes exactly as in the PyTorch module)
    conv_w = 0.1 * jax.random.normal(kw, (C_OUT, C_IN, K), dtype=jnp.float32)
    conv_b = 0.1 * jax.random.normal(kb, (C_OUT,), dtype=jnp.float32)
    bn_gamma = 1.0 + 0.1 * jax.random.normal(kg, (C_OUT,), dtype=jnp.float32)
    bn_beta = 0.1 * jax.random.normal(kbe, (C_OUT,), dtype=jnp.float32)
    bn_mean = 0.1 * jax.random.normal(km, (C_OUT,), dtype=jnp.float32)
    bn_var = jax.random.uniform(kv, (C_OUT,), jnp.float32, 0.5, 1.5)

    out = cnn1d_forward(x, conv_w, conv_b, bn_gamma, bn_beta, bn_mean, bn_var)
    out = jax.block_until_ready(out)
    assert out.shape == (N, C_OUT, L_POOL), out.shape

    ref = cnn1d_reference(x, conv_w, conv_b, bn_gamma, bn_beta, bn_mean, bn_var)
    ref = jax.block_until_ready(ref)
    assert jnp.allclose(out, ref, rtol=2e-3, atol=2e-3), float(
        jnp.max(jnp.abs(out - ref)))

    print("KERNEL_OK")
</pallas_src>

<mosaic_0001>
module attributes {stable_mosaic.version = 11 : i64} {
  func.func @cnn1d_fused_kernel(%arg0: i32, %arg1: memref<2x1x136xf32, #tpu.memory_space<vmem>>, %arg2: memref<8x9xf32, #tpu.memory_space<vmem>>, %arg3: memref<8x1xf32, #tpu.memory_space<vmem>>, %arg4: memref<8x1xf32, #tpu.memory_space<vmem>>, %arg5: memref<8x1xf32, #tpu.memory_space<vmem>>, %arg6: memref<128x32xf32, #tpu.memory_space<vmem>>, %arg7: memref<2x8x32xf32, #tpu.memory_space<vmem>>) attributes {dimension_semantics = [#tpu.dimension_semantics<arbitrary>], iteration_bounds = array<i64: 1>, scalar_prefetch = 0 : i64, scratch_operands = 0 : i64, tpu.core_type = #tpu.core_type<tc>, window_params = [{pipeline_mode = #tpu.pipeline_mode<synchronous>, transform_indices = @transform_0, window_bounds = array<i64: 2, 1, 136>}, {pipeline_mode = #tpu.pipeline_mode<synchronous>, transform_indices = @transform_1, window_bounds = array<i64: 8, 9>}, {pipeline_mode = #tpu.pipeline_mode<synchronous>, transform_indices = @transform_2, window_bounds = array<i64: 8, 1>}, {pipeline_mode = #tpu.pipeline_mode<synchronous>, transform_indices = @transform_3, window_bounds = array<i64: 8, 1>}, {pipeline_mode = #tpu.pipeline_mode<synchronous>, transform_indices = @transform_4, window_bounds = array<i64: 8, 1>}, {pipeline_mode = #tpu.pipeline_mode<synchronous>, transform_indices = @transform_5, window_bounds = array<i64: 128, 32>}, {pipeline_mode = #tpu.pipeline_mode<synchronous>, transform_indices = @transform_6, window_bounds = array<i64: 2, 8, 32>}]} {
    %c0 = arith.constant 0 : index
    %c0_0 = arith.constant 0 : index
    %0 = vector.load %arg2[%c0, %c0_0] : memref<8x9xf32, #tpu.memory_space<vmem>>, vector<8x9xf32>
    %c0_1 = arith.constant 0 : index
    %c0_2 = arith.constant 0 : index
    %1 = vector.load %arg3[%c0_1, %c0_2] : memref<8x1xf32, #tpu.memory_space<vmem>>, vector<8x1xf32>
    %c0_3 = arith.constant 0 : index
    %c0_4 = arith.constant 0 : index
    %2 = vector.load %arg4[%c0_3, %c0_4] : memref<8x1xf32, #tpu.memory_space<vmem>>, vector<8x1xf32>
    %c0_5 = arith.constant 0 : index
    %c0_6 = arith.constant 0 : index
    %3 = vector.load %arg5[%c0_5, %c0_6] : memref<8x1xf32, #tpu.memory_space<vmem>>, vector<8x1xf32>
    %c0_7 = arith.constant 0 : index
    %c0_8 = arith.constant 0 : index
    %4 = vector.load %arg6[%c0_7, %c0_8] : memref<128x32xf32, #tpu.memory_space<vmem>>, vector<128x32xf32>
    %c0_9 = arith.constant 0 : index
    %c0_10 = arith.constant 0 : index
    %c0_11 = arith.constant 0 : index
    %5 = vector.load %arg1[%c0_9, %c0_10, %c0_11] : memref<2x1x136xf32, #tpu.memory_space<vmem>>, vector<1x1x136xf32>
    %6 = vector.shape_cast %5 : vector<1x1x136xf32> to vector<1x136xf32>
    %7 = vector.extract_strided_slice %0 {offsets = [0, 0], sizes = [8, 1], strides = [1, 1]} : vector<8x9xf32> to vector<8x1xf32>
    %8 = vector.extract_strided_slice %6 {offsets = [0, 0], sizes = [1, 128], strides = [1, 1]} : vector<1x136xf32> to vector<1x128xf32>
    %9 = vector.broadcast %7 : vector<8x1xf32> to vector<8x128xf32>
    %10 = vector.broadcast %8 : vector<1x128xf32> to vector<8x128xf32>
    %11 = arith.mulf %9, %10 : vector<8x128xf32>
    %12 = vector.extract_strided_slice %0 {offsets = [0, 1], sizes = [8, 1], strides = [1, 1]} : vector<8x9xf32> to vector<8x1xf32>
    %13 = vector.extract_strided_slice %6 {offsets = [0, 1], sizes = [1, 128], strides = [1, 1]} : vector<1x136xf32> to vector<1x128xf32>
    %14 = vector.broadcast %12 : vector<8x1xf32> to vector<8x128xf32>
    %15 = vector.broadcast %13 : vector<1x128xf32> to vector<8x128xf32>
    %16 = arith.mulf %14, %15 : vector<8x128xf32>
    %17 = arith.addf %11, %16 : vector<8x128xf32>
    %18 = vector.extract_strided_slice %0 {offsets = [0, 2], sizes = [8, 1], strides = [1, 1]} : vector<8x9xf32> to vector<8x1xf32>
    %19 = vector.extract_strided_slice %6 {offsets = [0, 2], sizes = [1, 128], strides = [1, 1]} : vector<1x136xf32> to vector<1x128xf32>
    %20 = vector.broadcast %18 : vector<8x1xf32> to vector<8x128xf32>
    %21 = vector.broadcast %19 : vector<1x128xf32> to vector<8x128xf32>
    %22 = arith.mulf %20, %21 : vector<8x128xf32>
    %23 = arith.addf %17, %22 : vector<8x128xf32>
    %24 = vector.extract_strided_slice %0 {offsets = [0, 3], sizes = [8, 1], strides = [1, 1]} : vector<8x9xf32> to vector<8x1xf32>
    %25 = vector.extract_strided_slice %6 {offsets = [0, 3], sizes = [1, 128], strides = [1, 1]} : vector<1x136xf32> to vector<1x128xf32>
    %26 = vector.broadcast %24 : vector<8x1xf32> to vector<8x128xf32>
    %27 = vector.broadcast %25 : vector<1x128xf32> to vector<8x128xf32>
    %28 = arith.mulf %26, %27 : vector<8x128xf32>
    %29 = arith.addf %23, %28 : vector<8x128xf32>
    %30 = vector.extract_strided_slice %0 {offsets = [0, 4], sizes = [8, 1], strides = [1, 1]} : vector<8x9xf32> to vector<8x1xf32>
    %31 = vector.extract_strided_slice %6 {offsets = [0, 4], sizes = [1, 128], strides = [1, 1]} : vector<1x136xf32> to vector<1x128xf32>
    %32 = vector.broadcast %30 : vector<8x1xf32> to vector<8x128xf32>
    %33 = vector.broadcast %31 : vector<1x128xf32> to vector<8x128xf32>
    %34 = arith.mulf %32, %33 : vector<8x128xf32>
    %35 = arith.addf %29, %34 : vector<8x128xf32>
    %36 = vector.extract_strided_slice %0 {offsets = [0, 5], sizes = [8, 1], strides = [1, 1]} : vector<8x9xf32> to vector<8x1xf32>
    %37 = vector.extract_strided_slice %6 {offsets = [0, 5], sizes = [1, 128], strides = [1, 1]} : vector<1x136xf32> to vector<1x128xf32>
    %38 = vector.broadcast %36 : vector<8x1xf32> to vector<8x128xf32>
    %39 = vector.broadcast %37 : vector<1x128xf32> to vector<8x128xf32>
    %40 = arith.mulf %38, %39 : vector<8x128xf32>
    %41 = arith.addf %35, %40 : vector<8x128xf32>
    %42 = vector.extract_strided_slice %0 {offsets = [0, 6], sizes = [8, 1], strides = [1, 1]} : vector<8x9xf32> to vector<8x1xf32>
    %43 = vector.extract_strided_slice %6 {offsets = [0, 6], sizes = [1, 128], strides = [1, 1]} : vector<1x136xf32> to vector<1x128xf32>
    %44 = vector.broadcast %42 : vector<8x1xf32> to vector<8x128xf32>
    %45 = vector.broadcast %43 : vector<1x128xf32> to vector<8x128xf32>
    %46 = arith.mulf %44, %45 : vector<8x128xf32>
    %47 = arith.addf %41, %46 : vector<8x128xf32>
    %48 = vector.extract_strided_slice %0 {offsets = [0, 7], sizes = [8, 1], strides = [1, 1]} : vector<8x9xf32> to vector<8x1xf32>
    %49 = vector.extract_strided_slice %6 {offsets = [0, 7], sizes = [1, 128], strides = [1, 1]} : vector<1x136xf32> to vector<1x128xf32>
    %50 = vector.broadcast %48 : vector<8x1xf32> to vector<8x128xf32>
    %51 = vector.broadcast %49 : vector<1x128xf32> to vector<8x128xf32>
    %52 = arith.mulf %50, %51 : vector<8x128xf32>
    %53 = arith.addf %47, %52 : vector<8x128xf32>
    %54 = vector.extract_strided_slice %0 {offsets = [0, 8], sizes = [8, 1], strides = [1, 1]} : vector<8x9xf32> to vector<8x1xf32>
    %55 = vector.extract_strided_slice %6 {offsets = [0, 8], sizes = [1, 128], strides = [1, 1]} : vector<1x136xf32> to vector<1x128xf32>
    %56 = vector.broadcast %54 : vector<8x1xf32> to vector<8x128xf32>
    %57 = vector.broadcast %55 : vector<1x128xf32> to vector<8x128xf32>
    %58 = arith.mulf %56, %57 : vector<8x128xf32>
    %59 = arith.addf %53, %58 : vector<8x128xf32>
    %60 = vector.broadcast %1 : vector<8x1xf32> to vector<8x128xf32>
    %61 = arith.addf %59, %60 : vector<8x128xf32>
    %cst = arith.constant 5.000000e-01 : f32
    %62 = vector.broadcast %cst : f32 to vector<8x128xf32>
    %63 = arith.mulf %62, %61 : vector<8x128xf32>
    %cst_12 = arith.constant 0.707106769 : f32
    %64 = vector.broadcast %cst_12 : f32 to vector<8x128xf32>
    %65 = arith.mulf %61, %64 : vector<8x128xf32>
    %66 = math.erf %65 : vector<8x128xf32>
    %cst_13 = arith.constant 1.000000e+00 : f32
    %67 = vector.broadcast %cst_13 : f32 to vector<8x128xf32>
    %68 = arith.addf %67, %66 : vector<8x128xf32>
    %69 = arith.mulf %63, %68 : vector<8x128xf32>
    %70 = vector.broadcast %2 : vector<8x1xf32> to vector<8x128xf32>
    %71 = arith.mulf %69, %70 : vector<8x128xf32>
    %72 = vector.broadcast %3 : vector<8x1xf32> to vector<8x128xf32>
    %73 = arith.addf %71, %72 : vector<8x128xf32>
    %c127_i32 = arith.constant 127 : i32
    %74 = tpu.dynamic_rotate %73 by %c127_i32 dim 1 : vector<8x128xf32>, i32 -> vector<8x128xf32>
    %75 = arith.maximumf %73, %74 : vector<8x128xf32>
    %c126_i32 = arith.constant 126 : i32
    %76 = tpu.dynamic_rotate %73 by %c126_i32 dim 1 : vector<8x128xf32>, i32 -> vector<8x128xf32>
    %77 = arith.maximumf %75, %76 : vector<8x128xf32>
    %c125_i32 = arith.constant 125 : i32
    %78 = tpu.dynamic_rotate %73 by %c125_i32 dim 1 : vector<8x128xf32>, i32 -> vector<8x128xf32>
    %79 = arith.maximumf %77, %78 : vector<8x128xf32>
    %cst_14 = arith.constant dense<0.000000e+00> : vector<8x32xf32>
    %80 = tpu.matmul %79, %4, %cst_14 {dimension_numbers = #tpu.dot_dimension_numbers<[1], [0], [0], [1], [0, 0, 1, 1], [], []>} : vector<8x128xf32>, vector<128x32xf32>, vector<8x32xf32> -> vector<8x32xf32>
    %c0_15 = arith.constant 0 : index
    %c0_16 = arith.constant 0 : index
    %c0_17 = arith.constant 0 : index
    %81 = vector.load %arg7[%c0_15, %c0_16, %c0_17] : memref<2x8x32xf32, #tpu.memory_space<vmem>>, vector<1x8x32xf32>
    %82 = vector.shape_cast %81 : vector<1x8x32xf32> to vector<8x32xf32>
    %83 = vector.shape_cast %80 : vector<8x32xf32> to vector<1x8x32xf32>
    tpu.vector_store %arg7[%c0_15, %c0_16, %c0_17], %83 {strides = array<i32>} : memref<2x8x32xf32, #tpu.memory_space<vmem>>, vector<1x8x32xf32>,
    %c1 = arith.constant 1 : index
    %c0_18 = arith.constant 0 : index
    %c0_19 = arith.constant 0 : index
    %84 = vector.load %arg1[%c1, %c0_18, %c0_19] : memref<2x1x136xf32, #tpu.memory_space<vmem>>, vector<1x1x136xf32>
    %85 = vector.shape_cast %84 : vector<1x1x136xf32> to vector<1x136xf32>
    %86 = vector.extract_strided_slice %0 {offsets = [0, 0], sizes = [8, 1], strides = [1, 1]} : vector<8x9xf32> to vector<8x1xf32>
    %87 = vector.extract_strided_slice %85 {offsets = [0, 0], sizes = [1, 128], strides = [1, 1]} : vector<1x136xf32> to vector<1x128xf32>
    %88 = vector.broadcast %86 : vector<8x1xf32> to vector<8x128xf32>
    %89 = vector.broadcast %87 : vector<1x128xf32> to vector<8x128xf32>
    %90 = arith.mulf %88, %89 : vector<8x128xf32>
    %91 = vector.extract_strided_slice %0 {offsets = [0, 1], sizes = [8, 1], strides = [1, 1]} : vector<8x9xf32> to vector<8x1xf32>
    %92 = vector.extract_strided_slice %85 {offsets = [0, 1], sizes = [1, 128], strides = [1, 1]} : vector<1x136xf32> to vector<1x128xf32>
    %93 = vector.broadcast %91 : vector<8x1xf32> to vector<8x128xf32>
    %94 = vector.broadcast %92 : vector<1x128xf32> to vector<8x128xf32>
    %95 = arith.mulf %93, %94 : vector<8x128xf32>
    %96 = arith.addf %90, %95 : vector<8x128xf32>
    %97 = vector.extract_strided_slice %0 {offsets = [0, 2], sizes = [8, 1], strides = [1, 1]} : vector<8x9xf32> to vector<8x1xf32>
    %98 = vector.extract_strided_slice %85 {offsets = [0, 2], sizes = [1, 128], strides = [1, 1]} : vector<1x136xf32> to vector<1x128xf32>
    %99 = vector.broadcast %97 : vector<8x1xf32> to vector<8x128xf32>
    %100 = vector.broadcast %98 : vector<1x128xf32> to vector<8x128xf32>
    %101 = arith.mulf %99, %100 : vector<8x128xf32>
    %102 = arith.addf %96, %101 : vector<8x128xf32>
    %103 = vector.extract_strided_slice %0 {offsets = [0, 3], sizes = [8, 1], strides = [1, 1]} : vector<8x9xf32> to vector<8x1xf32>
    %104 = vector.extract_strided_slice %85 {offsets = [0, 3], sizes = [1, 128], strides = [1, 1]} : vector<1x136xf32> to vector<1x128xf32>
    %105 = vector.broadcast %103 : vector<8x1xf32> to vector<8x128xf32>
    %106 = vector.broadcast %104 : vector<1x128xf32> to vector<8x128xf32>
    %107 = arith.mulf %105, %106 : vector<8x128xf32>
    %108 = arith.addf %102, %107 : vector<8x128xf32>
    %109 = vector.extract_strided_slice %0 {offsets = [0, 4], sizes = [8, 1], strides = [1, 1]} : vector<8x9xf32> to vector<8x1xf32>
    %110 = vector.extract_strided_slice %85 {offsets = [0, 4], sizes = [1, 128], strides = [1, 1]} : vector<1x136xf32> to vector<1x128xf32>
    %111 = vector.broadcast %109 : vector<8x1xf32> to vector<8x128xf32>
    %112 = vector.broadcast %110 : vector<1x128xf32> to vector<8x128xf32>
    %113 = arith.mulf %111, %112 : vector<8x128xf32>
    %114 = arith.addf %108, %113 : vector<8x128xf32>
    %115 = vector.extract_strided_slice %0 {offsets = [0, 5], sizes = [8, 1], strides = [1, 1]} : vector<8x9xf32> to vector<8x1xf32>
    %116 = vector.extract_strided_slice %85 {offsets = [0, 5], sizes = [1, 128], strides = [1, 1]} : vector<1x136xf32> to vector<1x128xf32>
    %117 = vector.broadcast %115 : vector<8x1xf32> to vector<8x128xf32>
    %118 = vector.broadcast %116 : vector<1x128xf32> to vector<8x128xf32>
    %119 = arith.mulf %117, %118 : vector<8x128xf32>
    %120 = arith.addf %114, %119 : vector<8x128xf32>
    %121 = vector.extract_strided_slice %0 {offsets = [0, 6], sizes = [8, 1], strides = [1, 1]} : vector<8x9xf32> to vector<8x1xf32>
    %122 = vector.extract_strided_slice %85 {offsets = [0, 6], sizes = [1, 128], strides = [1, 1]} : vector<1x136xf32> to vector<1x128xf32>
    %123 = vector.broadcast %121 : vector<8x1xf32> to vector<8x128xf32>
    %124 = vector.broadcast %122 : vector<1x128xf32> to vector<8x128xf32>
    %125 = arith.mulf %123, %124 : vector<8x128xf32>
    %126 = arith.addf %120, %125 : vector<8x128xf32>
    %127 = vector.extract_strided_slice %0 {offsets = [0, 7], sizes = [8, 1], strides = [1, 1]} : vector<8x9xf32> to vector<8x1xf32>
    %128 = vector.extract_strided_slice %85 {offsets = [0, 7], sizes = [1, 128], strides = [1, 1]} : vector<1x136xf32> to vector<1x128xf32>
    %129 = vector.broadcast %127 : vector<8x1xf32> to vector<8x128xf32>
    %130 = vector.broadcast %128 : vector<1x128xf32> to vector<8x128xf32>
    %131 = arith.mulf %129, %130 : vector<8x128xf32>
    %132 = arith.addf %126, %131 : vector<8x128xf32>
    %133 = vector.extract_strided_slice %0 {offsets = [0, 8], sizes = [8, 1], strides = [1, 1]} : vector<8x9xf32> to vector<8x1xf32>
    %134 = vector.extract_strided_slice %85 {offsets = [0, 8], sizes = [1, 128], strides = [1, 1]} : vector<1x136xf32> to vector<1x128xf32>
    %135 = vector.broadcast %133 : vector<8x1xf32> to vector<8x128xf32>
    %136 = vector.broadcast %134 : vector<1x128xf32> to vector<8x128xf32>
    %137 = arith.mulf %135, %136 : vector<8x128xf32>
    %138 = arith.addf %132, %137 : vector<8x128xf32>
    %139 = vector.broadcast %1 : vector<8x1xf32> to vector<8x128xf32>
    %140 = arith.addf %138, %139 : vector<8x128xf32>
    %cst_20 = arith.constant 5.000000e-01 : f32
    %141 = vector.broadcast %cst_20 : f32 to vector<8x128xf32>
    %142 = arith.mulf %141, %140 : vector<8x128xf32>
    %cst_21 = arith.constant 0.707106769 : f32
    %143 = vector.broadcast %cst_21 : f32 to vector<8x128xf32>
    %144 = arith.mulf %140, %143 : vector<8x128xf32>
    %145 = math.erf %144 : vector<8x128xf32>
    %cst_22 = arith.constant 1.000000e+00 : f32
    %146 = vector.broadcast %cst_22 : f32 to vector<8x128xf32>
    %147 = arith.addf %146, %145 : vector<8x128xf32>
    %148 = arith.mulf %142, %147 : vector<8x128xf32>
    %149 = vector.broadcast %2 : vector<8x1xf32> to vector<8x128xf32>
    %150 = arith.mulf %148, %149 : vector<8x128xf32>
    %151 = vector.broadcast %3 : vector<8x1xf32> to vector<8x128xf32>
    %152 = arith.addf %150, %151 : vector<8x128xf32>
    %c127_i32_23 = arith.constant 127 : i32
    %153 = tpu.dynamic_rotate %152 by %c127_i32_23 dim 1 : vector<8x128xf32>, i32 -> vector<8x128xf32>
    %154 = arith.maximumf %152, %153 : vector<8x128xf32>
    %c126_i32_24 = arith.constant 126 : i32
    %155 = tpu.dynamic_rotate %152 by %c126_i32_24 dim 1 : vector<8x128xf32>, i32 -> vector<8x128xf32>
    %156 = arith.maximumf %154, %155 : vector<8x128xf32>
    %c125_i32_25 = arith.constant 125 : i32
    %157 = tpu.dynamic_rotate %152 by %c125_i32_25 dim 1 : vector<8x128xf32>, i32 -> vector<8x128xf32>
    %158 = arith.maximumf %156, %157 : vector<8x128xf32>
    %cst_26 = arith.constant dense<0.000000e+00> : vector<8x32xf32>
    %159 = tpu.matmul %158, %4, %cst_26 {dimension_numbers = #tpu.dot_dimension_numbers<[1], [0], [0], [1], [0, 0, 1, 1], [], []>} : vector<8x128xf32>, vector<128x32xf32>, vector<8x32xf32> -> vector<8x32xf32>
    %c1_27 = arith.constant 1 : index
    %c0_28 = arith.constant 0 : index
    %c0_29 = arith.constant 0 : index
    %160 = vector.load %arg7[%c1_27, %c0_28, %c0_29] : memref<2x8x32xf32, #tpu.memory_space<vmem>>, vector<1x8x32xf32>
    %161 = vector.shape_cast %160 : vector<1x8x32xf32> to vector<8x32xf32>
    %162 = vector.shape_cast %159 : vector<8x32xf32> to vector<1x8x32xf32>
    tpu.vector_store %arg7[%c1_27, %c0_28, %c0_29], %162 {strides = array<i32>} : memref<2x8x32xf32, #tpu.memory_space<vmem>>, vector<1x8x32xf32>,
    return
  }
  func.func @transform_0(%arg0: i32) -> (i32, i32, i32) {
    %c0_i32 = arith.constant 0 : i32
    %c0_i32_0 = arith.constant 0 : i32
    %c0_i32_1 = arith.constant 0 : i32
    %c0_i32_2 = arith.constant 0 : i32
    return %c0_i32, %c0_i32_0, %c0_i32_1 : i32, i32, i32
  }
  func.func @transform_1(%arg0: i32) -> (i32, i32) {
    %c0_i32 = arith.constant 0 : i32
    %c0_i32_0 = arith.constant 0 : i32
    %c0_i32_1 = arith.constant 0 : i32
    return %c0_i32, %c0_i32_0 : i32, i32
  }
  func.func @transform_2(%arg0: i32) -> (i32, i32) {
    %c0_i32 = arith.constant 0 : i32
    %c0_i32_0 = arith.constant 0 : i32
    %c0_i32_1 = arith.constant 0 : i32
    return %c0_i32, %c0_i32_0 : i32, i32
  }
  func.func @transform_3(%arg0: i32) -> (i32, i32) {
    %c0_i32 = arith.constant 0 : i32
    %c0_i32_0 = arith.constant 0 : i32
    %c0_i32_1 = arith.constant 0 : i32
    return %c0_i32, %c0_i32_0 : i32, i32
  }
  func.func @transform_4(%arg0: i32) -> (i32, i32) {
    %c0_i32 = arith.constant 0 : i32
    %c0_i32_0 = arith.constant 0 : i32
    %c0_i32_1 = arith.constant 0 : i32
    return %c0_i32, %c0_i32_0 : i32, i32
  }
  func.func @transform_5(%arg0: i32) -> (i32, i32) {
    %c0_i32 = arith.constant 0 : i32
    %c0_i32_0 = arith.constant 0 : i32
    %c0_i32_1 = arith.constant 0 : i32
    return %c0_i32, %c0_i32_0 : i32, i32
  }
  func.func @transform_6(%arg0: i32) -> (i32, i32, i32) {
    %c0_i32 = arith.constant 0 : i32
    %c0_i32_0 = arith.constant 0 : i32
    %c0_i32_1 = arith.constant 0 : i32
    %c0_i32_2 = arith.constant 0 : i32
    return %c0_i32, %c0_i32_0, %c0_i32_1 : i32, i32, i32
  }
}

</mosaic_0001>

<bundles_post_ra>
// kernel: cnn1d_forward.1
= control target key start
LH: loop header
LB: loop body
LE: loop exit
PB: predicated region body
PF: predicated region fallthrough
CT: control target
= control target key end

     0   :  { %v730_v1 = vmov 1   ;;  %v731_v2 = vmov 3   ;;  %s953_s0 = inlined_call_operand.vmem [shape: f32[2,1,136], index: 0, kind: input, shape index: {}]   ;;  %s954_s1 = inlined_call_operand.vmem [shape: f32[8,9], index: 1, kind: input, shape index: {}]   ;;  %s955_s2 = inlined_call_operand.vmem [shape: f32[8,1], index: 2, kind: input, shape index: {}]   ;;  %s956_s3 = inlined_call_operand.vmem [shape: f32[8,1], index: 3, kind: input, shape index: {}]   ;;  %s957_s4 = inlined_call_operand.vmem [shape: f32[8,1], index: 4, kind: input, shape index: {}]   ;;  %s958_s5 = inlined_call_operand.vmem [shape: f32[128,32], index: 5, kind: input, shape index: {}]   ;;  %s959_s6 = inlined_call_operand.hbm [shape: f32[2,8,32], index: 6, kind: output, shape index: {}]  }
   0x1   :  { %v24_v0 = vld [vmem:[%s954_s1] sm:$0xff]  ;;  %677 = vset.pattern.permute.xlu0 %v730_v1  ;;  %679 = vset.pattern.permute.xlu1 %v731_v2 }
   0x2   :  { %58 = vperm.xlu0 %677, %v24_v0   ;;  %95 = vperm.xlu1 %679, %v24_v0  }
   0x3   :  { %11 = vsyncpa [#allocation3], 0  ;;  %v732_v3 = vmov 2   ;;  %v733_v4 = vmov 4   ;;  %v734_v5 = vmov 5   ;;  %v735_v6 = vmov 6  }
   0x4   :  { %v736_v7 = vmov 7   ;;  %v737_v8 = vmov 0   ;;  %v25_v9 = vld [vmem:[%s955_s2] sm:$0xff]  ;;  %v738_v10 = vmov 8   ;;  %v51_v11 = vlaneseq  ;;  %s739_s2 = smov 127   ;;  %s741_s28 = smov 125  }
   0x5   :  { %v501_v14 = vld [vmem:[%s953_s0 + $0x2] sm:$0x3]  ;;  %v44_v15 = vld [vmem:[%s953_s0] sm:$0x3]  ;;  %s740_s0 = smov 126   ;;  %s742_s29 = smov 124  }
   0x6   :  { %678 = vset.pattern.permute.xlu0 %v732_v3  ;;  %680 = vset.pattern.permute.xlu1 %v733_v4  ;;  %v52_v12 = vshrl.u32 %v51_v11, 7  ;;  %s743_s30 = smov 123   ;;  %s744_s7 = smov 122   ;;  %v27_v60 = vld [vmem:[%s957_s4] sm:$0xff]  ;;  %v30_v1 = vld [vmem:[%s958_s5 + $0x10] sm:$0xff]  ;;  %v747_v2 = vmov 0.0|0.0  }
   0x7   :  { %79 = vperm.xlu0 %678, %v24_v0   ;;  %111 = vperm.xlu1 %680, %v24_v0   ;;  %s745_s8 = smov 121   ;;  %s746_s9 = smov 120   ;;  %v26_v62 = vld [vmem:[%s956_s3] sm:$0xff]  ;;  %v31_v4 = vld [vmem:[%s958_s5 + $0x18] sm:$0xff]  ;;  %vm74_vm0 = vcmask 1039360   ;;  %vm90_vm1 = vcmask 1031168  }
   0x8   :  { %v53_v13 = vsub.s32 0, %v52_v12  ;;  %v63_v18 = vsub.s32 1, %v52_v12  ;;  %v28_v63 = vld [vmem:[%s958_s5] sm:$0xff]  ;;  %606 = vmatprep.subr.bf16.mxu0 %v747_v2  ;;  %630 = vmatprep.subr.bf16.mxu1 %v747_v2  ;;  %vm106_vm2 = vcmask 1022976   ;;  %vm122_vm3 = vcmask 1014784  }
   0x9   :  { %v36_v12 = vld [vmem:[%s958_s5 + $0x40] sm:$0xff]  ;;  %vm138_vm4 = vcmask 1006592   ;;  %vm154_vm5 = vcmask 998400   ;;  %vm170_vm6 = vcmask 990208   ;;  %vm186_vm7 = vcmask 982016  }
   0xa   :  { %v800_v16 = vrot.slane %v501_v14, %v53_v13  ;;  %v802_v17 = vrot.slane %v44_v15, %v53_v13  ;;  %v806_v22 = vrot.slane %v44_v15, %v63_v18  ;;  %v811_v25 = vrot.slane %v501_v14, %v63_v18  ;;  %v37_v13 = vld [vmem:[%s958_s5 + $0x48] sm:$0xff]  ;;  %v38_v15 = vld [vmem:[%s958_s5 + $0x50] sm:$0xff]  ;;  %v39_v18 = vld [vmem:[%s958_s5 + $0x58] sm:$0xff] }
   0xb   :  { %681 = vset.pattern.permute.xlu1 %v734_v5  ;;  %682 = vset.pattern.permute.xlu0 %v735_v6  ;;  %v610_v5 = vpack.c.bf16 %v31_v4, %v30_v1  ;;  %v32_v6 = vld [vmem:[%s958_s5 + $0x20] sm:$0xff]  ;;  %v619_v14 = vpack.c.bf16 %v37_v13, %v36_v12  ;;  %vm748_vm8 = vmmov 0   ;;  %vm292_vm9 = vcmask 261120  }
   0xc   :  { %127 = vperm.xlu1 %681, %v24_v0   ;;  %143 = vperm.xlu0 %682, %v24_v0  }
  0x10   :  { %683 = vset.pattern.permute.xlu1 %v736_v7  ;;  %685 = vset.pattern.permute.xlu0 %v737_v8  ;;  %v33_v7 = vld [vmem:[%s958_s5 + $0x28] sm:$0xff] }
  0x11   :  { %159 = vperm.xlu1 %683, %v24_v0   ;;  %47 = vperm.xlu0 %685, %v24_v0  }
  0x15   :  { %684 = vset.pattern.permute.xlu1 %v738_v10  ;;  %192 = vperm.xlu0 %685, %v25_v9   ;;  %v34_v9 = vld [vmem:[%s958_s5 + $0x30] sm:$0xff]  ;;  %v35_v10 = vld [vmem:[%s958_s5 + $0x38] sm:$0xff] }
  0x16   :  { %175 = vperm.xlu1 %684, %v24_v0   ;;  %v29_v0 = vld [vmem:[%s958_s5 + $0x8] sm:$0xff]  ;;  %v616_v11 = vpack.c.bf16 %v35_v10, %v34_v9 }
  0x17   :  { %v607_v3 = vpack.c.bf16 %v29_v0, %v28_v63 }
  0x19   :  { %608 = vmatpush3.bf16.msra.mxu0 %v607_v3  ;;  %632 = vmatpush3.bf16.msra.mxu1 %v607_v3 }
  0x1a   :  { %686 = vset.pattern.permute.xlu1 %v737_v8  ;;  %609 = vmatprep.subr.bf16.mxu0 %v747_v2  ;;  %v613_v8 = vpack.c.bf16 %v33_v7, %v32_v6 }
  0x1b   :  { %633 = vmatprep.subr.bf16.mxu1 %v747_v2 }
  0x1d   :  { %611 = vmatpush3.bf16.msra.mxu0 %v610_v5  ;;  %635 = vmatpush3.bf16.msra.mxu1 %v610_v5 }
  0x1e   :  { %612 = vmatprep.subr.bf16.mxu0 %v747_v2  ;;  %636 = vmatprep.subr.bf16.mxu1 %v747_v2 }
  0x21   :  { %614 = vmatpush3.bf16.msra.mxu0 %v613_v8  ;;  %638 = vmatpush3.bf16.msra.mxu1 %v613_v8 }
  0x22   :  { %615 = vmatprep.subr.bf16.mxu0 %v747_v2  ;;  %639 = vmatprep.subr.bf16.mxu1 %v747_v2 }
  0x25   :  { %617 = vmatpush3.bf16.msra.mxu0 %v616_v11  ;;  %641 = vmatpush3.bf16.msra.mxu1 %v616_v11 }
  0x26   :  { %618 = vmatprep.subr.bf16.mxu0 %v747_v2  ;;  %642 = vmatprep.subr.bf16.mxu1 %v747_v2 }
  0x29   :  { %620 = vmatpush3.bf16.msra.mxu0 %v619_v14  ;;  %644 = vmatpush3.bf16.msra.mxu1 %v619_v14 }
  0x2a   :  { %621 = vmatprep.subr.bf16.mxu0 %v747_v2  ;;  %645 = vmatprep.subr.bf16.mxu1 %v747_v2 }
  0x81   :  { %v59_v19 = vpop.permute.xlu0 %58  ;;  %v96_v29 = vpop.permute.xlu1 %95 }
  0x82   :  { %v308_v20 = vmul.f32 %v800_v16, %v59_v19  ;;  %v66_v21 = vmul.f32 %v59_v19, %v802_v17  ;;  %v67_v24 = vmul.f32 %v806_v22, %v59_v19  ;;  %v309_v28 = vmul.f32 %v811_v25, %v59_v19 }
  0x83   :  { %v98_v31 = vmul.f32 %v96_v29, %v802_v17  ;;  %v330_v32 = vmul.f32 %v800_v16, %v96_v29  ;;  %v99_v35 = vmul.f32 %v96_v29, %v806_v22  ;;  %v331_v38 = vmul.f32 %v811_v25, %v96_v29 }
  0x84   :  { %312 = vrot.lane.b32.xlu0 %v308_v20, %s739_s2  ;;  %70 = vrot.lane.b32.xlu1 %v66_v21, %s739_s2  ;;  %v622_v19 = vpack.c.bf16 %v39_v18, %v38_v15 }
  0x86   :  { %v80_v23 = vpop.permute.xlu0 %79  ;;  %v112_v34 = vpop.permute.xlu1 %111  ;;  %623 = vmatpush3.bf16.msra.mxu0 %v622_v19  ;;  %647 = vmatpush3.bf16.msra.mxu1 %v622_v19 }
  0x87   :  { %v82_v26 = vmul.f32 %v80_v23, %v802_v17  ;;  %v319_v27 = vmul.f32 %v800_v16, %v80_v23  ;;  %v83_v30 = vmul.f32 %v80_v23, %v806_v22  ;;  %v320_v33 = vmul.f32 %v811_v25, %v80_v23  ;;  %624 = vmatprep.subr.bf16.mxu0 %v747_v2 }
  0x88   :  { %72 = vrot.lane.b32.xlu1 %v67_v24, %s739_s2  ;;  %v114_v36 = vmul.f32 %v112_v34, %v802_v17  ;;  %v341_v37 = vmul.f32 %v800_v16, %v112_v34  ;;  %v115_v40 = vmul.f32 %v112_v34, %v806_v22  ;;  %v342_v43 = vmul.f32 %v811_v25, %v112_v34 }
  0x89   :  { %86 = vrot.lane.b32.xlu0 %v82_v26, %s740_s0  ;;  %648 = vmatprep.subr.bf16.mxu1 %v747_v2 }
  0x8b   :  { %v128_v39 = vpop.permute.xlu1 %127  ;;  %v144_v44 = vpop.permute.xlu0 %143 }
  0x8c   :  { %314 = vrot.lane.b32.xlu1 %v309_v28, %s739_s2  ;;  %v130_v41 = vmul.f32 %v128_v39, %v802_v17  ;;  %v352_v42 = vmul.f32 %v800_v16, %v128_v39  ;;  %v131_v45 = vmul.f32 %v128_v39, %v806_v22  ;;  %v146_v46 = vmul.f32 %v144_v44, %v802_v17 }
  0x8d   :  { %323 = vrot.lane.b32.xlu0 %v319_v27, %s740_s0  ;;  %v364_v47 = vmul.f32 %v811_v25, %v144_v44  ;;  %v353_v48 = vmul.f32 %v811_v25, %v128_v39  ;;  %v147_v50 = vmul.f32 %v144_v44, %v806_v22  ;;  %v363_v53 = vmul.f32 %v800_v16, %v144_v44 }
  0x90   :  { %88 = vrot.lane.b32.xlu1 %v83_v30, %s740_s0  ;;  %v160_v49 = vpop.permute.xlu1 %159  ;;  %v48_v20 = vpop.permute.xlu0 %47 }
  0x91   :  { %102 = vrot.lane.b32.xlu0 %v98_v31, %s741_s28  ;;  %v163_v51 = vmul.f32 %v160_v49, %v806_v22  ;;  %v375_v52 = vmul.f32 %v811_v25, %v160_v49  ;;  %v162_v55 = vmul.f32 %v160_v49, %v802_v17  ;;  %v374_v58 = vmul.f32 %v800_v16, %v160_v49 }
  0x94   :  { %325 = vrot.lane.b32.xlu1 %v320_v33, %s740_s0  ;;  %v908_v21 = vpop.permute.xlu0 %192 }
  0x95   :  { %334 = vrot.lane.b32.xlu0 %v330_v32, %s741_s28  ;;  %v176_v54 = vpop.permute.xlu1 %175 }
  0x96   :  { %v179_v56 = vmul.f32 %v176_v54, %v806_v22  ;;  %v386_v57 = vmul.f32 %v811_v25, %v176_v54  ;;  %v178_v59 = vmul.f32 %v176_v54, %v802_v17  ;;  %v385_v61 = vmul.f32 %v800_v16, %v176_v54 }
  0x98   :  { %104 = vrot.lane.b32.xlu1 %v99_v35, %s741_s28 }
  0x99   :  { %118 = vrot.lane.b32.xlu0 %v114_v36, %s742_s29 }
  0x9c   :  { %336 = vrot.lane.b32.xlu1 %v331_v38, %s741_s28 }
  0x9d   :  { %345 = vrot.lane.b32.xlu0 %v341_v37, %s742_s29 }
  0xa0   :  { %120 = vrot.lane.b32.xlu1 %v115_v40, %s742_s29 }
  0xa1   :  { %134 = vrot.lane.b32.xlu0 %v130_v41, %s743_s30 }
  0xa4   :  { %347 = vrot.lane.b32.xlu1 %v342_v43, %s742_s29 }
  0xa5   :  { %356 = vrot.lane.b32.xlu0 %v352_v42, %s743_s30 }
  0xa8   :  { %136 = vrot.lane.b32.xlu1 %v131_v45, %s743_s30 }
  0xa9   :  { %150 = vrot.lane.b32.xlu0 %v146_v46, %s744_s7  ;;  %v56_v46 = vmul.f32 %v802_v17, %v48_v20 }
  0xac   :  { %358 = vrot.lane.b32.xlu1 %v353_v48, %s743_s30 }
  0xad   :  { %369 = vrot.lane.b32.xlu0 %v364_v47, %s744_s7 }
  0xb0   :  { %152 = vrot.lane.b32.xlu1 %v147_v50, %s744_s7 }
  0xb1   :  { %168 = vrot.lane.b32.xlu0 %v163_v51, %s745_s8 }
  0xb4   :  { %367 = vrot.lane.b32.xlu1 %v363_v53, %s744_s7  ;;  %v302_v53 = vmul.f32 %v800_v16, %v48_v20 }
  0xb5   :  { %380 = vrot.lane.b32.xlu0 %v375_v52, %s745_s8 }
  0xb8   :  { %166 = vrot.lane.b32.xlu1 %v162_v55, %s745_s8 }
  0xb9   :  { %184 = vrot.lane.b32.xlu0 %v179_v56, %s746_s9 }
  0xbc   :  { %378 = vrot.lane.b32.xlu1 %v374_v58, %s745_s8 }
  0xbd   :  { %391 = vrot.lane.b32.xlu0 %v386_v57, %s746_s9 }
  0xc0   :  { %182 = vrot.lane.b32.xlu1 %v178_v59, %s746_s9 }
  0xc1   :  { %209 = vperm.xlu0 %685, %v27_v60  }
  0xc4   :  { %389 = vrot.lane.b32.xlu1 %v385_v61, %s746_s9 }
  0xc8   :  { %203 = vperm.xlu1 %686, %v26_v62  }
  0xf6   :  { %v71_v22 = vpop.permute.xlu1 %70  ;;  %v313_v23 = vpop.permute.xlu0 %312 }
  0xfa   :  { %v73_v24 = vpop.permute.xlu1 %72 }
  0xfb   :  { %v87_v25 = vpop.permute.xlu0 %86  ;;  %v75_v45 = vsel %vm74_vm0, %v71_v22, %v73_v24 }
  0xfc   :  { %v77_v49 = vadd.f32 %v75_v45, %v56_v46  ;;  %v749_v46 = vmov 0.0  }
  0xfd   :  { %568 = vmatprep.mubr.msk.f32.mxu0 %vm748_vm8, %v749_v46  ;;  %603 = vmatprep.mubr.msk.f32.mxu1 %vm748_vm8, %v749_v46 }
  0xfe   :  { %v315_v26 = vpop.permute.xlu1 %314 }
  0xff   :  { %v324_v27 = vpop.permute.xlu0 %323  ;;  %v316_v51 = vsel %vm74_vm0, %v313_v23, %v315_v26 }
 0x100   :  { %v318_v57 = vadd.f32 %v316_v51, %v302_v53 }
 0x102   :  { %v89_v28 = vpop.permute.xlu1 %88 }
 0x103   :  { %v103_v29 = vpop.permute.xlu0 %102  ;;  %v91_v48 = vsel %vm90_vm1, %v87_v25, %v89_v28 }
 0x104   :  { %v93_v54 = vadd.f32 %v91_v48, %v77_v49 }
 0x106   :  { %v326_v30 = vpop.permute.xlu1 %325 }
 0x107   :  { %v335_v31 = vpop.permute.xlu0 %334  ;;  %v327_v55 = vsel %vm90_vm1, %v324_v27, %v326_v30 }
 0x108   :  { %v329_v62 = vadd.f32 %v327_v55, %v318_v57 }
 0x10a   :  { %v105_v32 = vpop.permute.xlu1 %104 }
 0x10b   :  { %v119_v33 = vpop.permute.xlu0 %118  ;;  %v107_v52 = vsel %vm106_vm2, %v103_v29, %v105_v32  ;;  %v41_v32 = vld [vmem:[%s958_s5 + $0x68] sm:$0xff] }
 0x10c   :  { %v109_v58 = vadd.f32 %v107_v52, %v93_v54 }
 0x10e   :  { %v337_v34 = vpop.permute.xlu1 %336 }
 0x10f   :  { %v346_v35 = vpop.permute.xlu0 %345  ;;  %v338_v60 = vsel %vm106_vm2, %v335_v31, %v337_v34  ;;  %v40_v31 = vld [vmem:[%s958_s5 + $0x60] sm:$0xff] }
 0x110   :  { %v340_v1 = vadd.f32 %v338_v60, %v329_v62 }
 0x112   :  { %v121_v36 = vpop.permute.xlu1 %120 }
 0x113   :  { %v135_v37 = vpop.permute.xlu0 %134  ;;  %v123_v56 = vsel %vm122_vm3, %v119_v33, %v121_v36 }
 0x114   :  { %v125_v63 = vadd.f32 %v123_v56, %v109_v58 }
 0x116   :  { %v348_v38 = vpop.permute.xlu1 %347 }
 0x117   :  { %v357_v39 = vpop.permute.xlu0 %356  ;;  %v349_v0 = vsel %vm122_vm3, %v346_v35, %v348_v38  ;;  %v625_v35 = vpack.c.bf16 %v41_v32, %v40_v31 }
 0x118   :  { %v351_v7 = vadd.f32 %v349_v0, %v340_v1 }
 0x119   :  { %626 = vmatpush3.bf16.msra.mxu0 %v625_v35  ;;  %650 = vmatpush3.bf16.msra.mxu1 %v625_v35 }
 0x11a   :  { %v137_v40 = vpop.permute.xlu1 %136  ;;  %627 = vmatprep.subr.bf16.mxu0 %v747_v2  ;;  %651 = vmatprep.subr.bf16.mxu1 %v747_v2 }
 0x11b   :  { %v151_v41 = vpop.permute.xlu0 %150  ;;  %v139_v61 = vsel %vm138_vm4, %v135_v37, %v137_v40 }
 0x11c   :  { %v141_v3 = vadd.f32 %v139_v61, %v125_v63 }
 0x11e   :  { %v359_v42 = vpop.permute.xlu1 %358 }
 0x11f   :  { %v370_v43 = vpop.permute.xlu0 %369  ;;  %v360_v5 = vsel %vm138_vm4, %v357_v39, %v359_v42  ;;  %v43_v39 = vld [vmem:[%s958_s5 + $0x78] sm:$0xff] }
 0x120   :  { %v362_v11 = vadd.f32 %v360_v5, %v351_v7 }
 0x122   :  { %v153_v44 = vpop.permute.xlu1 %152 }
 0x123   :  { %v169_v47 = vpop.permute.xlu0 %168  ;;  %v155_v16 = vsel %vm154_vm5, %v151_v41, %v153_v44 }
 0x124   :  { %v157_v8 = vadd.f32 %v155_v16, %v141_v3 }
 0x126   :  { %v368_v50 = vpop.permute.xlu1 %367 }
 0x127   :  { %v381_v59 = vpop.permute.xlu0 %380  ;;  %v371_v10 = vsel %vm154_vm5, %v368_v50, %v370_v43 }
 0x128   :  { %v373_v18 = vadd.f32 %v371_v10, %v362_v11 }
 0x12a   :  { %v167_v17 = vpop.permute.xlu1 %166 }
 0x12b   :  { %v171_v6 = vsel %vm170_vm6, %v167_v17, %v169_v47  ;;  %v185_v9 = vpop.permute.xlu0 %184 }
 0x12c   :  { %v173_v12 = vadd.f32 %v171_v6, %v157_v8 }
 0x12e   :  { %v379_v4 = vpop.permute.xlu1 %378 }
 0x12f   :  { %v382_v14 = vsel %vm170_vm6, %v379_v4, %v381_v59  ;;  %v392_v23 = vpop.permute.xlu0 %391 }
 0x130   :  { %v384_v20 = vadd.f32 %v382_v14, %v373_v18 }
 0x132   :  { %v183_v13 = vpop.permute.xlu1 %182 }
 0x133   :  { %v187_v15 = vsel %vm186_vm7, %v183_v13, %v185_v9 }
 0x134   :  { %v189_v19 = vadd.f32 %v187_v15, %v173_v12 }
 0x136   :  { %v195_v22 = vadd.f32 %v908_v21, %v189_v19  ;;  %v390_v24 = vpop.permute.xlu1 %389 }
 0x137   :  { %v393_v25 = vsel %vm186_vm7, %v390_v24, %v392_v23 }
 0x138   :  { %v197_v26 = vmul.f32 0.70710677, %v195_v22  ;;  %v395_v27 = vadd.f32 %v393_v25, %v384_v20  ;;  %v196_v33 = vmul.f32 0.5, %v195_v22 }
 0x13a   :  { %702 = verf.f32 %v197_v26  ;;  %v396_v28 = vadd.f32 %v395_v27, %v908_v21  ;;  %v42_v21 = vld [vmem:[%s958_s5 + $0x70] sm:$0xff]  ;;  %s750_s5 = smov [#allocation2]  }
 0x13b   :  { %v628_v42 = vpack.c.bf16 %v43_v39, %v42_v21 }
 0x13c   :  { %v398_v29 = vmul.f32 0.70710677, %v396_v28  ;;  %v397_v40 = vmul.f32 0.5, %v396_v28 }
 0x13d   :  { %629 = vmatpush3.bf16.msra.mxu0 %v628_v42  ;;  %653 = vmatpush3.bf16.msra.mxu1 %v628_v42 }
 0x13e   :  { %704 = verf.f32 %v398_v29 }
 0x140   :  { %v210_v2 = vpop.permute.xlu0 %209 }
 0x144   :  { %v703_v30 = vpop.eup %702 }
 0x145   :  { %v199_v34 = vadd.f32 1.0, %v703_v30 }
 0x147   :  { %v200_v36 = vmul.f32 %v199_v34, %v196_v33  ;;  %v204_v38 = vpop.permute.xlu1 %203 }
 0x148   :  { %v705_v37 = vpop.eup %704 }
 0x149   :  { %v400_v41 = vadd.f32 1.0, %v705_v37  ;;  %v206_v43 = vmul.f32 %v204_v38, %v200_v36 }
 0x14b   :  { %v401_v44 = vmul.f32 %v400_v41, %v397_v40  ;;  %v212_v47 = vadd.f32 %v210_v2, %v206_v43 }
 0x14d   :  { %v402_v45 = vmul.f32 %v401_v44, %v204_v38 }
 0x14f   :  { %v403_v48 = vadd.f32 %v402_v45, %v210_v2 }
 0x151   :  { %v692_v49 = vpack.i.bf16 %v403_v48, %v212_v47 }
 0x153   :  { %693 = vrot.lane.b32.xlu0 %v692_v49, %s740_s0  ;;  %688 = vrot.lane.b32.xlu1 %v692_v49, %s739_s2  ;;  %s490_s2 = sshll.u32 %s750_s5, 4  ;;  %s491_s2 = int_to_ptr.vmem [resolvable:$true] %s490_s2 }
 0x154   :  { %s706_s0 = scalar_lea.vmem %s491_s2, 256  ;;  %p711_p1 = scmp.lt.s32.totalorder %s491_s2, %s491_s2 }
 0x155   :  { %p707_p0 = scmp.ne.s32.totalorder %s491_s2, %s706_s0  ;;  %p712_p2 = scmp.lt.s32.totalorder %s706_s0, %s706_s0 }
 0x157   :  { %698 = vrot.lane.b32.xlu1 %v692_v49, %s741_s28  ;;  %p713_p3 = por %p712_p2, %p711_p1 }
 0x159   :  { %p714_p4 = pnand %p713_p3, %p707_p0 }
 0x1c5   :  { %v694_v50 = vpop.permute.xlu0 %693  ;;  %v689_v51 = vpop.permute.xlu1 %688 }
 0x1c6   :  { %v691_v52 = vunpack.i.h.bf16 %v689_v51  ;;  %v690_v53 = vunpack.i.l.bf16 %v689_v51  ;;  %v696_v54 = vunpack.i.h.bf16 %v694_v50  ;;  %v695_v55 = vunpack.i.l.bf16 %v694_v50 }
 0x1c8   :  { %v406_v56 = vmax.f32 %v403_v48, %v691_v52  ;;  %v215_v57 = vmax.f32 %v212_v47, %v690_v53 }
 0x1c9   :  { %v699_v58 = vpop.permute.xlu1 %698 }
 0x1ca   :  { %v701_v17 = vunpack.i.h.bf16 %v699_v58  ;;  %v700_v59 = vunpack.i.l.bf16 %v699_v58  ;;  %v218_v60 = vmax.f32 %v215_v57, %v695_v55  ;;  %v409_v61 = vmax.f32 %v406_v56, %v696_v54 }
 0x1cc   :  { %v221_v62 = vmax.f32 %v218_v60, %v700_v59  ;;  %v412_v63 = vmax.f32 %v409_v61, %v701_v17 }
 0x1ce   :  { %569 = vmatmul.mubr.f32.vlgmr.msra.gmra.mrb[0].mxu0 %v221_v62  ;;  %604 = vmatmul.mubr.f32.vlgmr.msra.gmra.mrb[0].mxu1 %v412_v63 }
 0x2a1   :  { %v288_v0 = vpop.f32.mrb[0].mxu0  ;;  %v479_v16 = vpop.f32.mrb[0].mxu1 }
 0x2a2   :  { %293 = vst.msk [vmem:[#allocation2] sm:$0xff] %vm292_vm9, %v288_v0  ;;  %484 = vst.msk [vmem:[#allocation2 + $0x8] sm:$0xff] %vm292_vm9, %v479_v16  ;;  %v570_v1 = vpop.f32.mrb[1].mxu0  ;;  %v605_v3 = vpop.f32.mrb[1].mxu1 }
 0x2a3   :  { %717 = shalt.err (!%p714_p4)
}
 0x2a4   :  { %s718_s19 = scalar_lea.hbm %s959_s6, 256 }
 0x2a5   :  { %p719_p5 = scmp.ne.s32.totalorder %s959_s6, %s718_s19  ;;  %p722_p6 = scmp.lt.u32.totalorder %s718_s19, %s959_s6 }
 0x2a7   :  { %p724_p7 = pnand %p722_p6, %p719_p5 }
 0x2a9   :  { %727 = shalt.err (!%p724_p7)
}
 0x2aa   :  { %s751_s23 = smov 128   ;;  %s752_s24 = smov 8  }
 0x2ab   :  { %496 = dma.vmem_to_hbm [thread:$0]  %s491_s2, 256, %s959_s6, [#allocation3], %s751_s23, %s751_s23, %s752_s24  }
 0x2ac   :  { %728 = dma.done.wait [#allocation3], 256  }
 0x2ad   :  { %729 = vsyncadd [#allocation3], 4294967040 }
 0x2ae   :  { %500 = vsyncpa [#allocation3], 1 }

</bundles_post_ra>
